<compile_context>
chip_gen: v7x
topology: tpu7x:2x2x1
jax: 0.10.0
libtpu: 0.0.40
codegen_flags: <defaults>
</compile_context>

<pallas_src>
import functools

import jax
import jax.numpy as jnp
import numpy as np
from jax.experimental import pallas as pl
from jax.experimental.pallas import tpu as pltpu


def _conv_block_kernel(x_ref, w_ref, b_ref, o_ref, xvert_ref, *,
                       Nb, H, WCin, WCout, KH, ph0, negative_slope):
    """One grid step = Nb images.

    x_ref:     (Nb, H, WCin)        lane-dense input block (W*Cin on lanes)
    w_ref:     (KH, WCin, WCout)    block-Toeplitz weight slabs (one per kh tap)
    b_ref:     (1, WCout)           bias tiled over w (bias[co] at lane w*Cout+co)
    o_ref:     (Nb*H, WCout)        lane-dense output block
    xvert_ref: (Nb, H+KH-1, WCin)   VMEM scratch: vertically zero-padded input
    """
    # 1) Vertical 'same' padding: zero ONLY the halo rows (the interior is
    #    fully overwritten below).  Horizontal padding is handled by the
    #    structural zeros in w_ref, so no horizontal halo exists at all.
    #    Do NOT gate this on program_id == 0 (v7x 'parallel' core split).
    top = ph0
    bot = KH - 1 - ph0
    if top > 0:
        xvert_ref[:, :top, :] = jnp.zeros((Nb, top, WCin), xvert_ref.dtype)
    if bot > 0:
        xvert_ref[:, top + H:, :] = jnp.zeros((Nb, bot, WCin), xvert_ref.dtype)
    xvert_ref[:, top:top + H, :] = x_ref[...]

    # 2) KH accumulating MXU matmuls; result is already (Nb*H, W*Cout) lane-
    #    dense, so there is no im2col scratch and no output relayout.
    acc = jnp.zeros((Nb * H, WCout), jnp.float32)
    for kh in range(KH):
        lhs = xvert_ref[:, kh:kh + H, :].reshape(Nb * H, WCin)
        acc += jax.lax.dot_general(
            lhs, w_ref[kh],
            dimension_numbers=(((1,), (0,)), ((), ())),
            preferred_element_type=jnp.float32)

    # 3) Epilogue: bias + Dropout(p=0 == identity) + LeakyReLU (slope 0.01).
    # TODO(synk): for r_drop > 0 (training) draw a mask via pltpu.prng_seed /
    # pltpu.prng_random_bits and scale by 1/(1-p).
    acc = acc + b_ref[...].astype(jnp.float32)
    acc = jnp.where(acc > 0, acc, negative_slope * acc)
    o_ref[...] = acc.astype(o_ref.dtype)


def _toeplitz_weights(weight, W, pw0):
    """(Cout, Cin, KH, KW) -> (KH, W*Cin, W*Cout) block-Toeplitz slabs.

    T[kh, w_in*Cin + ci, w_out*Cout + co] = weight[co, ci, kh, w_in - w_out + pw0]
    when 0 <= w_in - w_out + pw0 < KW, else 0.  The structural zeros also
    implement the horizontal 'same' padding, so the kernel never materializes
    horizontally padded input.
    """
    Cout, Cin, KH, KW = weight.shape
    w_t = jnp.transpose(weight, (2, 3, 1, 0))              # (KH, KW, Cin, Cout)
    w_in = jnp.arange(W)[:, None]
    w_out = jnp.arange(W)[None, :]
    kw = w_in - w_out + pw0                                # (W, W)
    valid = (kw >= 0) & (kw < KW)
    t5 = w_t[:, jnp.clip(kw, 0, KW - 1)]                   # (KH, W_in, W_out, Cin, Cout)
    t5 = jnp.where(valid[None, :, :, None, None], t5, 0)
    t5 = jnp.transpose(t5, (0, 1, 3, 2, 4))                # (KH, W_in, Cin, W_out, Cout)
    return t5.reshape(KH, W * Cin, W * Cout)


def _tpu_topology():
    """(per-core VMEM bytes, TensorCores per chip) with conservative fallbacks."""
    vmem_cap = 64 * 1024 * 1024      # v7x per-core VMEM (smallest generation)
    n_cores = 2                      # conservative: assume a megacore-style split
    try:
        kind = jax.devices()[0].device_kind.lower()
        if ("lite" in kind) or ("v5e" in kind) or ("v6e" in kind):
            vmem_cap = 128 * 1024 * 1024
            n_cores = 1              # single TensorCore: no reason to force >=2 steps
    except Exception:
        pass
    try:
        v = getattr(pltpu.get_tpu_info(), "vmem_capacity_bytes", None)
        if v:
            vmem_cap = int(v)
    except Exception:
        pass
    return max(vmem_cap, 32 * 1024 * 1024), n_cores


def conv_block(x_nchw, weight, bias, *, negative_slope=0.01):
    """Forward pass of ConvBlock. x_nchw: (N, Cin, H, W); weight: (Cout, Cin, KH, KW)."""
    N, Cin, H, W = x_nchw.shape
    Cout, Cin_w, KH, KW = weight.shape
    assert Cin == Cin_w

    ph0 = (KH - 1) // 2                     # 'same' offsets (odd kernels, k=5)
    pw0 = (KW - 1) // 2
    Hp = H + KH - 1
    WCin, WCout = W * Cin, W * Cout

    # Lane-dense operands: channel folded into the lane axis with width W.
    x = jnp.transpose(x_nchw, (0, 2, 3, 1)).reshape(N, H, WCin)   # (N, H, W*Cin)
    w = _toeplitz_weights(weight, W, pw0)                         # (KH, W*Cin, W*Cout)
    b = jnp.tile(bias, W).reshape(1, WCout)                       # bias[co] at lane w*Cout+co

    # ---- images-per-step (Nb) against a per-generation VMEM budget ----
    in_item = np.dtype(x_nchw.dtype).itemsize
    w_item = np.dtype(weight.dtype).itemsize
    per_image = (2 * H * WCin * in_item        # double-buffered input block
                 + 2 * H * WCout * in_item     # double-buffered output block
                 + Hp * WCin * in_item         # vertical-pad scratch (single buffer)
                 + H * WCout * 4               # f32 accumulator
                 + H * WCin * 4)               # live lhs slice
    fixed = 2 * (KH * WCin * WCout + WCout) * w_item   # resident weight + bias blocks
    vmem_cap, n_cores = _tpu_topology()
    budget = max(1 << 20, vmem_cap // 2 - fixed)
    nb_cap = max(1, budget // per_image)
    if n_cores >= 2 and N >= 2:
        # keep >= 2 'parallel' steps so both TensorCores get work (v7x);
        # single-core v5e/v6e take the whole batch in one step.
        nb_cap = min(nb_cap, max(1, N // 2))
    Nb = max(d for d in range(1, N + 1) if N % d == 0 and d <= nb_cap)
    if H % 8 != 0:
        Nb = N   # output block (Nb*H, WCout) must be 8-row aligned unless it spans the array
    grid = (N // Nb,)
    vmem_limit = int(min(vmem_cap, max(32 * 1024 * 1024, 2 * (fixed + Nb * per_image))))

    # TODO(synk): add an H-row grid axis (with a KH-1 row halo) for very large
    # H*W*C where a whole image / the Toeplitz slab no longer fits in VMEM.

    kernel = functools.partial(
        _conv_block_kernel, Nb=Nb, H=H, WCin=WCin, WCout=WCout,
        KH=KH, ph0=ph0, negative_slope=negative_slope)

    out = pl.pallas_call(
        kernel,
        out_shape=jax.ShapeDtypeStruct((N * H, WCout), x_nchw.dtype),
        grid_spec=pltpu.PrefetchScalarGridSpec(
            num_scalar_prefetch=0,
            grid=grid,
            in_specs=[
                pl.BlockSpec((Nb, H, WCin), lambda n: (n, 0, 0)),
                pl.BlockSpec((KH, WCin, WCout), lambda n: (0, 0, 0)),
                pl.BlockSpec((1, WCout), lambda n: (0, 0)),
            ],
            out_specs=pl.BlockSpec((Nb * H, WCout), lambda n: (n, 0)),
            scratch_shapes=[
                pltpu.VMEM((Nb, Hp, WCin), x_nchw.dtype),
            ],
        ),
        compiler_params=pltpu.CompilerParams(
            dimension_semantics=("parallel",),
            vmem_limit_bytes=vmem_limit),
    )(x, w, b)

    out = out.reshape(N, H, W, Cout)            # wrapper-side metadata reshape
    return jnp.transpose(out, (0, 3, 1, 2))     # -> NCHW (public interface)


def _reference(x_nchw, weight, bias, negative_slope=0.01):
    y = jax.lax.conv_general_dilated(
        x_nchw, weight, window_strides=(1, 1), padding="SAME",
        dimension_numbers=("NCHW", "OIHW", "NCHW"))
    y = y + bias[None, :, None, None]
    return jnp.where(y > 0, y, negative_slope * y)


if __name__ == "__main__":
    # Small deterministic config consistent with the module (nin=nout, k=5,
    # padding='same').  W * Cin = W * Cout = 16 * 8 = 128 -> lane-dense rows.
    N, Cin, Cout, H, W, K = 2, 8, 8, 16, 16, 5

    key = jax.random.PRNGKey(0)
    kx, kw, kb = jax.random.split(key, 3)

    x = jax.random.normal(kx, (N, Cin, H, W), dtype=jnp.float32)
    fan_in = Cin * K * K
    bound = 1.0 / np.sqrt(fan_in)
    weight = jax.random.uniform(kw, (Cout, Cin, K, K), jnp.float32, -bound, bound)
    bias = jax.random.uniform(kb, (Cout,), jnp.float32, -bound, bound)

    out = jax.jit(conv_block)(x, weight, bias)
    out = jax.block_until_ready(out)

    ref = _reference(x, weight, bias)
    np.testing.assert_allclose(np.asarray(out), np.asarray(ref), atol=1e-4, rtol=1e-4)

    print("KERNEL_OK")
</pallas_src>

<mosaic_0001>
module attributes {stable_mosaic.version = 11 : i64} {
  func.func @_conv_block_kernel(%arg0: i32, %arg1: memref<1x16x128xf32, #tpu.memory_space<vmem>>, %arg2: memref<5x128x128xf32, #tpu.memory_space<vmem>>, %arg3: memref<1x128xf32, #tpu.memory_space<vmem>>, %arg4: memref<16x128xf32, #tpu.memory_space<vmem>>, %arg5: memref<1x20x128xf32, #tpu.memory_space<vmem>>) attributes {dimension_semantics = [#tpu.dimension_semantics<parallel>], iteration_bounds = array<i64: 2>, scalar_prefetch = 0 : i64, scratch_operands = 1 : i64, tpu.core_type = #tpu.core_type<tc>, window_params = [{transform_indices = @transform_0, window_bounds = array<i64: 1, 16, 128>}, {pipeline_mode = #tpu.pipeline_mode<synchronous>, transform_indices = @transform_1, window_bounds = array<i64: 5, 128, 128>}, {pipeline_mode = #tpu.pipeline_mode<synchronous>, transform_indices = @transform_2, window_bounds = array<i64: 1, 128>}, {transform_indices = @transform_3, window_bounds = array<i64: 16, 128>}]} {
    %cst = arith.constant 0.000000e+00 : f32
    %0 = vector.broadcast %cst : f32 to vector<1x2x128xf32>
    %c0 = arith.constant 0 : index
    %c0_0 = arith.constant 0 : index
    %c0_1 = arith.constant 0 : index
    %1 = vector.load %arg5[%c0, %c0_0, %c0_1] : memref<1x20x128xf32, #tpu.memory_space<vmem>>, vector<1x2x128xf32>
    tpu.vector_store %arg5[%c0, %c0_0, %c0_1], %0 {strides = array<i32>} : memref<1x20x128xf32, #tpu.memory_space<vmem>>, vector<1x2x128xf32>,
    %cst_2 = arith.constant 0.000000e+00 : f32
    %2 = vector.broadcast %cst_2 : f32 to vector<1x2x128xf32>
    %c0_3 = arith.constant 0 : index
    %c18 = arith.constant 18 : index
    %c0_4 = arith.constant 0 : index
    %3 = vector.load %arg5[%c0_3, %c18, %c0_4] : memref<1x20x128xf32, #tpu.memory_space<vmem>>, vector<1x2x128xf32>
    tpu.vector_store %arg5[%c0_3, %c18, %c0_4], %2 {strides = array<i32>} : memref<1x20x128xf32, #tpu.memory_space<vmem>>, vector<1x2x128xf32>,
    %c0_5 = arith.constant 0 : index
    %c0_6 = arith.constant 0 : index
    %c0_7 = arith.constant 0 : index
    %4 = vector.load %arg1[%c0_5, %c0_6, %c0_7] : memref<1x16x128xf32, #tpu.memory_space<vmem>>, vector<1x16x128xf32>
    %c0_8 = arith.constant 0 : index
    %c2 = arith.constant 2 : index
    %c0_9 = arith.constant 0 : index
    %5 = vector.load %arg5[%c0_8, %c2, %c0_9] : memref<1x20x128xf32, #tpu.memory_space<vmem>>, vector<1x16x128xf32>
    tpu.vector_store %arg5[%c0_8, %c2, %c0_9], %4 {strides = array<i32>} : memref<1x20x128xf32, #tpu.memory_space<vmem>>, vector<1x16x128xf32>,
    %cst_10 = arith.constant 0.000000e+00 : f32
    %6 = vector.broadcast %cst_10 : f32 to vector<16x128xf32>
    %c0_11 = arith.constant 0 : index
    %c0_12 = arith.constant 0 : index
    %c0_13 = arith.constant 0 : index
    %7 = vector.load %arg5[%c0_11, %c0_12, %c0_13] : memref<1x20x128xf32, #tpu.memory_space<vmem>>, vector<1x16x128xf32>
    %8 = vector.shape_cast %7 : vector<1x16x128xf32> to vector<16x128xf32>
    %c0_14 = arith.constant 0 : index
    %c0_15 = arith.constant 0 : index
    %c0_16 = arith.constant 0 : index
    %9 = vector.load %arg2[%c0_14, %c0_15, %c0_16] : memref<5x128x128xf32, #tpu.memory_space<vmem>>, vector<1x128x128xf32>
    %10 = vector.shape_cast %9 : vector<1x128x128xf32> to vector<128x128xf32>
    %cst_17 = arith.constant dense<0.000000e+00> : vector<16x128xf32>
    %11 = tpu.matmul %8, %10, %cst_17 {dimension_numbers = #tpu.dot_dimension_numbers<[1], [0], [0], [1], [0, 0, 1, 1], [], []>} : vector<16x128xf32>, vector<128x128xf32>, vector<16x128xf32> -> vector<16x128xf32>
    %12 = arith.addf %6, %11 : vector<16x128xf32>
    %c0_18 = arith.constant 0 : index
    %c1 = arith.constant 1 : index
    %c0_19 = arith.constant 0 : index
    %13 = vector.load %arg5[%c0_18, %c1, %c0_19] : memref<1x20x128xf32, #tpu.memory_space<vmem>>, vector<1x16x128xf32>
    %14 = vector.shape_cast %13 : vector<1x16x128xf32> to vector<16x128xf32>
    %c1_20 = arith.constant 1 : index
    %c0_21 = arith.constant 0 : index
    %c0_22 = arith.constant 0 : index
    %15 = vector.load %arg2[%c1_20, %c0_21, %c0_22] : memref<5x128x128xf32, #tpu.memory_space<vmem>>, vector<1x128x128xf32>
    %16 = vector.shape_cast %15 : vector<1x128x128xf32> to vector<128x128xf32>
    %cst_23 = arith.constant dense<0.000000e+00> : vector<16x128xf32>
    %17 = tpu.matmul %14, %16, %cst_23 {dimension_numbers = #tpu.dot_dimension_numbers<[1], [0], [0], [1], [0, 0, 1, 1], [], []>} : vector<16x128xf32>, vector<128x128xf32>, vector<16x128xf32> -> vector<16x128xf32>
    %18 = arith.addf %12, %17 : vector<16x128xf32>
    %c0_24 = arith.constant 0 : index
    %c2_25 = arith.constant 2 : index
    %c0_26 = arith.constant 0 : index
    %19 = vector.load %arg5[%c0_24, %c2_25, %c0_26] : memref<1x20x128xf32, #tpu.memory_space<vmem>>, vector<1x16x128xf32>
    %20 = vector.shape_cast %19 : vector<1x16x128xf32> to vector<16x128xf32>
    %c2_27 = arith.constant 2 : index
    %c0_28 = arith.constant 0 : index
    %c0_29 = arith.constant 0 : index
    %21 = vector.load %arg2[%c2_27, %c0_28, %c0_29] : memref<5x128x128xf32, #tpu.memory_space<vmem>>, vector<1x128x128xf32>
    %22 = vector.shape_cast %21 : vector<1x128x128xf32> to vector<128x128xf32>
    %cst_30 = arith.constant dense<0.000000e+00> : vector<16x128xf32>
    %23 = tpu.matmul %20, %22, %cst_30 {dimension_numbers = #tpu.dot_dimension_numbers<[1], [0], [0], [1], [0, 0, 1, 1], [], []>} : vector<16x128xf32>, vector<128x128xf32>, vector<16x128xf32> -> vector<16x128xf32>
    %24 = arith.addf %18, %23 : vector<16x128xf32>
    %c0_31 = arith.constant 0 : index
    %c3 = arith.constant 3 : index
    %c0_32 = arith.constant 0 : index
    %25 = vector.load %arg5[%c0_31, %c3, %c0_32] : memref<1x20x128xf32, #tpu.memory_space<vmem>>, vector<1x16x128xf32>
    %26 = vector.shape_cast %25 : vector<1x16x128xf32> to vector<16x128xf32>
    %c3_33 = arith.constant 3 : index
    %c0_34 = arith.constant 0 : index
    %c0_35 = arith.constant 0 : index
    %27 = vector.load %arg2[%c3_33, %c0_34, %c0_35] : memref<5x128x128xf32, #tpu.memory_space<vmem>>, vector<1x128x128xf32>
    %28 = vector.shape_cast %27 : vector<1x128x128xf32> to vector<128x128xf32>
    %cst_36 = arith.constant dense<0.000000e+00> : vector<16x128xf32>
    %29 = tpu.matmul %26, %28, %cst_36 {dimension_numbers = #tpu.dot_dimension_numbers<[1], [0], [0], [1], [0, 0, 1, 1], [], []>} : vector<16x128xf32>, vector<128x128xf32>, vector<16x128xf32> -> vector<16x128xf32>
    %30 = arith.addf %24, %29 : vector<16x128xf32>
    %c0_37 = arith.constant 0 : index
    %c4 = arith.constant 4 : index
    %c0_38 = arith.constant 0 : index
    %31 = vector.load %arg5[%c0_37, %c4, %c0_38] : memref<1x20x128xf32, #tpu.memory_space<vmem>>, vector<1x16x128xf32>
    %32 = vector.shape_cast %31 : vector<1x16x128xf32> to vector<16x128xf32>
    %c4_39 = arith.constant 4 : index
    %c0_40 = arith.constant 0 : index
    %c0_41 = arith.constant 0 : index
    %33 = vector.load %arg2[%c4_39, %c0_40, %c0_41] : memref<5x128x128xf32, #tpu.memory_space<vmem>>, vector<1x128x128xf32>
    %34 = vector.shape_cast %33 : vector<1x128x128xf32> to vector<128x128xf32>
    %cst_42 = arith.constant dense<0.000000e+00> : vector<16x128xf32>
    %35 = tpu.matmul %32, %34, %cst_42 {dimension_numbers = #tpu.dot_dimension_numbers<[1], [0], [0], [1], [0, 0, 1, 1], [], []>} : vector<16x128xf32>, vector<128x128xf32>, vector<16x128xf32> -> vector<16x128xf32>
    %36 = arith.addf %30, %35 : vector<16x128xf32>
    %c0_43 = arith.constant 0 : index
    %c0_44 = arith.constant 0 : index
    %37 = vector.load %arg3[%c0_43, %c0_44] : memref<1x128xf32, #tpu.memory_space<vmem>>, vector<1x128xf32>
    %38 = vector.broadcast %37 : vector<1x128xf32> to vector<16x128xf32>
    %39 = arith.addf %36, %38 : vector<16x128xf32>
    %cst_45 = arith.constant 0.000000e+00 : f32
    %40 = vector.broadcast %cst_45 : f32 to vector<16x128xf32>
    %41 = arith.cmpf ogt, %39, %40 : vector<16x128xf32>
    %cst_46 = arith.constant 0.00999999977 : f32
    %42 = vector.broadcast %cst_46 : f32 to vector<16x128xf32>
    %43 = arith.mulf %42, %39 : vector<16x128xf32>
    %44 = arith.select %41, %39, %43 : vector<16x128xi1>, vector<16x128xf32>
    %c0_47 = arith.constant 0 : index
    %c0_48 = arith.constant 0 : index
    %45 = vector.load %arg4[%c0_47, %c0_48] : memref<16x128xf32, #tpu.memory_space<vmem>>, vector<16x128xf32>
    tpu.vector_store %arg4[%c0_47, %c0_48], %44 {strides = array<i32>} : memref<16x128xf32, #tpu.memory_space<vmem>>, vector<16x128xf32>,
    return
  }
  func.func @transform_0(%arg0: i32) -> (i32, i32, i32) {
    %c0_i32 = arith.constant 0 : i32
    %c0_i32_0 = arith.constant 0 : i32
    %c0_i32_1 = arith.constant 0 : i32
    return %arg0, %c0_i32, %c0_i32_0 : i32, i32, i32
  }
  func.func @transform_1(%arg0: i32) -> (i32, i32, i32) {
    %c0_i32 = arith.constant 0 : i32
    %c0_i32_0 = arith.constant 0 : i32
    %c0_i32_1 = arith.constant 0 : i32
    %c0_i32_2 = arith.constant 0 : i32
    return %c0_i32, %c0_i32_0, %c0_i32_1 : i32, i32, i32
  }
  func.func @transform_2(%arg0: i32) -> (i32, i32) {
    %c0_i32 = arith.constant 0 : i32
    %c0_i32_0 = arith.constant 0 : i32
    %c0_i32_1 = arith.constant 0 : i32
    return %c0_i32, %c0_i32_0 : i32, i32
  }
  func.func @transform_3(%arg0: i32) -> (i32, i32) {
    %c0_i32 = arith.constant 0 : i32
    %c0_i32_0 = arith.constant 0 : i32
    return %arg0, %c0_i32 : i32, i32
  }
}

</mosaic_0001>

<bundles_post_ra>
// kernel: tile.8
= control target key start
LH: loop header
LB: loop body
LE: loop exit
PB: predicated region body
PF: predicated region fallthrough
CT: control target
= control target key end

     0   :  { %s28_s0 = inlined_call_operand.vmem [shape: f32[8], index: 0, kind: input, shape index: {}]   ;;  %s29_s1 = inlined_call_operand.vmem [shape: f32[16,8], index: 1, kind: output, shape index: {}]  }
   0x1   :  { %v4_v0 = vld [vmem:[%s28_s0] ss:$0 sm:$0xff] }
   0x2   :  { %5 = vst [vmem:[%s29_s1] sm:$0xff] %v4_v0  ;;  %8 = vst [vmem:[%s29_s1 + $0x8] sm:$0xff] %v4_v0 }

// kernel: tile.9
= control target key start
LH: loop header
LB: loop body
LE: loop exit
PB: predicated region body
PF: predicated region fallthrough
CT: control target
= control target key end

     0   :  { %s131_s10 = smov 120   ;;  %s132_s11 = smov 104   ;;  %vm3_vm0 = vcmask 64512   ;;  %vm9_vm1 = vcmask 1048512   ;;  %vm15_vm2 = vcmask 982912   ;;  %vm21_vm3 = vcmask 917312   ;;  %s207_s0 = inlined_call_operand.vmem [shape: f32[16,8], index: 0, kind: input, shape index: {}]   ;;  %s208_s1 = inlined_call_operand.vmem [shape: f32[1,128], index: 1, kind: output, shape index: {}]  }
   0x1   :  { %v101_v0 = vld [vmem:[%s207_s0 + $0xf] sm:$0x1]   ;;  %v103_v1 = vld [vmem:[%s207_s0 + $0xd] sm:$0x1]   ;;  %v102_v2 = vld [vmem:[%s207_s0 + $0xe] sm:$0x1]  }
   0x2   :  { %7 = vrot.lane.b32.xlu0 %v101_v0, %s131_s10  ;;  %19 = vrot.lane.b32.xlu1 %v103_v1, %s132_s11  ;;  %v104_v3 = vld [vmem:[%s207_s0 + $0xc] sm:$0x1]   ;;  %s133_s16 = smov 112   ;;  %s134_s17 = smov 96   ;;  %v105_v4 = vld [vmem:[%s207_s0 + $0xb] sm:$0x1]  }
   0x3   :  { %v106_v5 = vld [vmem:[%s207_s0 + $0xa] sm:$0x1]   ;;  %v2_v6 = vld [vmem:[%s207_s0] sm:$0x1]   ;;  %s135_s24 = smov 88   ;;  %s136_s25 = smov 80  }
   0x4   :  { %4 = vst.msk [vmem:[#allocation0] sm:$0x1] %vm3_vm0, %v2_v6   ;;  %v107_v7 = vld [vmem:[%s207_s0 + $0x9] sm:$0x1]   ;;  %v108_v8 = vld [vmem:[%s207_s0 + $0x8] sm:$0x1]  }
   0x5   :  { %s137_s30 = smov 72   ;;  %s138_s2 = smov 64   ;;  %v109_v9 = vld [vmem:[%s207_s0 + $0x7] sm:$0x1]   ;;  %v110_v10 = vld [vmem:[%s207_s0 + $0x6] sm:$0x1]  }
   0x6   :  { %13 = vrot.lane.b32.xlu0 %v102_v2, %s133_s16  ;;  %25 = vrot.lane.b32.xlu1 %v104_v3, %s134_s17  ;;  %s139_s7 = smov 56   ;;  %s140_s8 = smov 48   ;;  %v111_v11 = vld [vmem:[%s207_s0 + $0x5] sm:$0x1]   ;;  %v112_v12 = vld [vmem:[%s207_s0 + $0x4] sm:$0x1]  }
   0x7   :  { %s141_s13 = smov 40   ;;  %s142_s14 = smov 32   ;;  %v113_v13 = vld [vmem:[%s207_s0 + $0x3] sm:$0x1]   ;;  %v114_v14 = vld [vmem:[%s207_s0 + $0x2] sm:$0x1]  }
   0x8   :  { %s143_s19 = smov 24   ;;  %s144_s20 = smov 16   ;;  %v115_v15 = vld [vmem:[%s207_s0 + $0x1] sm:$0x1]   ;;  %vm27_vm4 = vcmask 851712   ;;  %vm33_vm5 = vcmask 786112  }
   0x9   :  { %s145_s0 = smov 8   ;;  %vm39_vm6 = vcmask 720512   ;;  %vm45_vm7 = vcmask 654912   ;;  %vm51_vm8 = vcmask 589312   ;;  %vm57_vm9 = vcmask 523712  }
   0xa   :  { %31 = vrot.lane.b32.xlu0 %v105_v4, %s135_s24  ;;  %37 = vrot.lane.b32.xlu1 %v106_v5, %s136_s25  ;;  %vm63_vm10 = vcmask 458112   ;;  %vm69_vm11 = vcmask 392512   ;;  %vm75_vm12 = vcmask 326912   ;;  %vm81_vm13 = vcmask 261312  }
   0xb   :  { %vm87_vm14 = vcmask 195712   ;;  %vm93_vm15 = vcmask 130112  }
   0xe   :  { %43 = vrot.lane.b32.xlu0 %v107_v7, %s137_s30  ;;  %49 = vrot.lane.b32.xlu1 %v108_v8, %s138_s2 }
  0x12   :  { %55 = vrot.lane.b32.xlu0 %v109_v9, %s139_s7  ;;  %61 = vrot.lane.b32.xlu1 %v110_v10, %s140_s8 }
  0x16   :  { %67 = vrot.lane.b32.xlu0 %v111_v11, %s141_s13  ;;  %73 = vrot.lane.b32.xlu1 %v112_v12, %s142_s14 }
  0x1a   :  { %79 = vrot.lane.b32.xlu0 %v113_v13, %s143_s19  ;;  %85 = vrot.lane.b32.xlu1 %v114_v14, %s144_s20 }
  0x1e   :  { %91 = vrot.lane.b32.xlu0 %v115_v15, %s145_s0 }
  0x74   :  { %v8_v16 = vpop.permute.xlu0 %7   ;;  %v20_v17 = vpop.permute.xlu1 %19  }
  0x75   :  { %10 = vst.msk [vmem:[#allocation0] sm:$0x1] %vm9_vm1, %v8_v16  }
  0x78   :  { %v14_v18 = vpop.permute.xlu0 %13   ;;  %v26_v19 = vpop.permute.xlu1 %25  }
  0x79   :  { %16 = vst.msk [vmem:[#allocation0] sm:$0x1] %vm15_vm2, %v14_v18  }
  0x7a   :  { %22 = vst.msk [vmem:[#allocation0] sm:$0x1] %vm21_vm3, %v20_v17  }
  0x7b   :  { %28 = vst.msk [vmem:[#allocation0] sm:$0x1] %vm27_vm4, %v26_v19  }
  0x7c   :  { %v32_v20 = vpop.permute.xlu0 %31   ;;  %v38_v21 = vpop.permute.xlu1 %37  }
  0x7d   :  { %34 = vst.msk [vmem:[#allocation0] sm:$0x1] %vm33_vm5, %v32_v20  }
  0x7e   :  { %40 = vst.msk [vmem:[#allocation0] sm:$0x1] %vm39_vm6, %v38_v21  }
  0x80   :  { %v44_v22 = vpop.permute.xlu0 %43   ;;  %v50_v23 = vpop.permute.xlu1 %49  }
  0x81   :  { %46 = vst.msk [vmem:[#allocation0] sm:$0x1] %vm45_vm7, %v44_v22  }
  0x82   :  { %52 = vst.msk [vmem:[#allocation0] sm:$0x1] %vm51_vm8, %v50_v23  }
  0x84   :  { %v56_v24 = vpop.permute.xlu0 %55   ;;  %v62_v25 = vpop.permute.xlu1 %61  }
  0x85   :  { %58 = vst.msk [vmem:[#allocation0] sm:$0x1] %vm57_vm9, %v56_v24  }
  0x86   :  { %64 = vst.msk [vmem:[#allocation0] sm:$0x1] %vm63_vm10, %v62_v25  }
  0x88   :  { %v68_v26 = vpop.permute.xlu0 %67   ;;  %v74_v27 = vpop.permute.xlu1 %73  }
  0x89   :  { %70 = vst.msk [vmem:[#allocation0] sm:$0x1] %vm69_vm11, %v68_v26  }
  0x8a   :  { %76 = vst.msk [vmem:[#allocation0] sm:$0x1] %vm75_vm12, %v74_v27  }
  0x8c   :  { %v80_v28 = vpop.permute.xlu0 %79   ;;  %v86_v29 = vpop.permute.xlu1 %85  }
  0x8d   :  { %82 = vst.msk [vmem:[#allocation0] sm:$0x1] %vm81_vm13, %v80_v28  }
  0x8e   :  { %88 = vst.msk [vmem:[#allocation0] sm:$0x1] %vm87_vm14, %v86_v29  }
  0x90   :  { %v92_v30 = vpop.permute.xlu0 %91  }
  0x91   :  { %94 = vst.msk [vmem:[#allocation0] sm:$0x1] %vm93_vm15, %v92_v30  }
  0x98   :  { %v98_v31 = vld [vmem:[#allocation0] sm:$0x1] }
  0x99   :  { %100 = vst [vmem:[%s208_s1] sm:$0x1] %v98_v31 }

// kernel: conv_block.1
= control target key start
LH: loop header
LB: loop body
LE: loop exit
PB: predicated region body
PF: predicated region fallthrough
CT: control target
= control target key end

     0   :  { %s1274_s12 = smov 0   ;;  %s1543_s0 = inlined_call_operand.vmem [shape: f32[2,16,128], index: 0, kind: input, shape index: {}]   ;;  %s1544_s1 = inlined_call_operand.vmem [shape: f32[5,128,128], index: 1, kind: input, shape index: {}]   ;;  %s1545_s2 = inlined_call_operand.vmem [shape: f32[1,128], index: 2, kind: input, shape index: {}]   ;;  %s1546_s3 = inlined_call_operand.vmem [shape: f32[32,128], index: 3, kind: output, shape index: {}]  }
   0x1 LB: > { %s1280_s13 = sadd.s32 4294967295, %s1251_s12   ;;  %p730_p0 = scmp.ge.s32.totalorder %s1251_s12, 1  ;;  %s1251_s12 = sphi %s1274_s12, %s13_s12  }
   0x2   : > { %p137_p1 = scmp.lt.s32.totalorder %s1251_s12, 3 }
   0x4   : > { %p138_p2 = pnand %p730_p0, %p137_p1 }
   0x5   : > { %v735_v0 = vld [vmem:[%s1544_s1 + $0x80] sm:$0xff] (!%p138_p2)  ;;  %v736_v1 = vld [vmem:[%s1544_s1 + $0x88] sm:$0xff] (!%p138_p2)  ;;  %p161_p3 = scmp.lt.s32.totalorder (!%p138_p2), %s1280_s13, 1  ;;  %v737_v5 = vld [vmem:[%s1544_s1 + $0x90] sm:$0xff] (!%p138_p2)  ;;  %v1253_v7 = vmov (!%p138_p2), 0.0   ;;  %s733_s29 = sshll.u32 (!%p138_p2), %s1280_s13, 1 }
   0x6   : > { %141 = sbr.rel (%p138_p2) target bundleno = 326 (0x146), region = 32  ;;  %v751_v2 = vld [vmem:[%s1544_s1 + $0x100] sm:$0xff] (!%p138_p2)  ;;  %v1068_v3 = vpack.c.bf16 (!%p138_p2), %v736_v1, %v735_v0  ;;  %v752_v4 = vld [vmem:[%s1544_s1 + $0x108] sm:$0xff] (!%p138_p2)  ;;  %v738_v6 = vld [vmem:[%s1544_s1 + $0x98] sm:$0xff] (!%p138_p2)  ;;  %172 = vst [vmem:[#allocation2] sm:$0x3] (!%p138_p2), %v1253_v7 }
   0x7   : > { %173 = vst [vmem:[#allocation2 + $0x12] sm:$0x3] (!%p138_p2), %v1253_v7  ;;  %v1132_v8 = vpack.c.bf16 (!%p138_p2), %v752_v4, %v751_v2  ;;  %v1072_v9 = vpack.c.bf16 (!%p138_p2), %v738_v6, %v737_v5  ;;  %v753_v10 = vld [vmem:[%s1544_s1 + $0x110] sm:$0xff] (!%p138_p2)  ;;  %v754_v11 = vld [vmem:[%s1544_s1 + $0x118] sm:$0xff] (!%p138_p2)  ;;  %v739_v12 = vld [vmem:[%s1544_s1 + $0xa0] sm:$0xff] (!%p138_p2)  ;;  %p167_p4 = scmp.lt.s32.totalorder (!%p138_p2), %s733_s29, 3 }
   0x8   : > { %1069 = vmatprep.subr.bf16.mxu1 (!%p138_p2), %v1068_v3  ;;  %v1136_v13 = vpack.c.bf16 (!%p138_p2), %v754_v11, %v753_v10  ;;  %v740_v14 = vld [vmem:[%s1544_s1 + $0xa8] sm:$0xff] (!%p138_p2)  ;;  %v755_v15 = vld [vmem:[%s1544_s1 + $0x120] sm:$0xff] (!%p138_p2)  ;;  %v741_v19 = vld [vmem:[%s1544_s1 + $0xb0] sm:$0xff] (!%p138_p2) }
   0x9   : > { %v756_v16 = vld [vmem:[%s1544_s1 + $0x128] sm:$0xff] (!%p138_p2)  ;;  %1133 = vmatprep.subr.bf16.mxu0 (!%p138_p2), %v1132_v8  ;;  %1071 = vmatpush3.bf16.msra.mxu1 (!%p138_p2), %v1068_v3  ;;  %v1076_v17 = vpack.c.bf16 (!%p138_p2), %v740_v14, %v739_v12  ;;  %v742_v20 = vld [vmem:[%s1544_s1 + $0xb8] sm:$0xff] (!%p138_p2)  ;;  %v757_v21 = vld [vmem:[%s1544_s1 + $0x130] sm:$0xff] (!%p138_p2) }
   0xa   : > { %1135 = vmatpush3.bf16.msra.mxu0 (!%p138_p2), %v1132_v8  ;;  %1073 = vmatprep.subr.bf16.mxu1 (!%p138_p2), %v1072_v9  ;;  %v1140_v18 = vpack.c.bf16 (!%p138_p2), %v756_v16, %v755_v15  ;;  %v758_v22 = vld [vmem:[%s1544_s1 + $0x138] sm:$0xff] (!%p138_p2)  ;;  %v1080_v23 = vpack.c.bf16 (!%p138_p2), %v742_v20, %v741_v19  ;;  %v743_v25 = vld [vmem:[%s1544_s1 + $0xc0] sm:$0xff] (!%p138_p2)  ;;  %v744_v26 = vld [vmem:[%s1544_s1 + $0xc8] sm:$0xff] (!%p138_p2) }
   0xb   : > { %1137 = vmatprep.subr.bf16.mxu0 (!%p138_p2), %v1136_v13  ;;  %v1144_v24 = vpack.c.bf16 (!%p138_p2), %v758_v22, %v757_v21  ;;  %v759_v28 = vld [vmem:[%s1544_s1 + $0x140] sm:$0xff] (!%p138_p2)  ;;  %v760_v29 = vld [vmem:[%s1544_s1 + $0x148] sm:$0xff] (!%p138_p2)  ;;  %v1084_v31 = vpack.c.bf16 (!%p138_p2), %v744_v26, %v743_v25  ;;  %v745_v33 = vld [vmem:[%s1544_s1 + $0xd0] sm:$0xff] (!%p138_p2) }
   0xc   : > { %v1148_v32 = vpack.c.bf16 (!%p138_p2), %v760_v29, %v759_v28  ;;  %v746_v34 = vld [vmem:[%s1544_s1 + $0xd8] sm:$0xff] (!%p138_p2)  ;;  %v761_v35 = vld [vmem:[%s1544_s1 + $0x150] sm:$0xff] (!%p138_p2)  ;;  %v747_v39 = vld [vmem:[%s1544_s1 + $0xe0] sm:$0xff] (!%p138_p2) }
   0xd   : > { %s162_s5 = scalar_select %p161_p3, %s1280_s13, 1  ;;  %1075 = vmatpush3.bf16.msra.mxu1 %v1072_v9  ;;  %v762_v36 = vld [vmem:[%s1544_s1 + $0x158] sm:$0xff]  ;;  %v1088_v37 = vpack.c.bf16 %v746_v34, %v745_v33  ;;  %v748_v40 = vld [vmem:[%s1544_s1 + $0xe8] sm:$0xff]  ;;  %v763_v42 = vld [vmem:[%s1544_s1 + $0x160] sm:$0xff] }
   0xe   : > { %1139 = vmatpush3.bf16.msra.mxu0 %v1136_v13  ;;  %1077 = vmatprep.subr.bf16.mxu1 %v1076_v17  ;;  %v1152_v38 = vpack.c.bf16 %v762_v36, %v761_v35  ;;  %v764_v43 = vld [vmem:[%s1544_s1 + $0x168] sm:$0xff]  ;;  %v1092_v44 = vpack.c.bf16 %v748_v40, %v747_v39  ;;  %v749_v46 = vld [vmem:[%s1544_s1 + $0xf0] sm:$0xff]  ;;  %v750_v47 = vld [vmem:[%s1544_s1 + $0xf8] sm:$0xff]  ;;  %s1548_s29 = smov (!%p167_p4, %s733_s29), 3 }
   0xf   : > { %s802_s14 = sshll.u32 %s162_s5, 4  ;;  %1141 = vmatprep.subr.bf16.mxu0 %v1140_v18  ;;  %v1156_v45 = vpack.c.bf16 %v764_v43, %v763_v42  ;;  %v765_v48 = vld [vmem:[%s1544_s1 + $0x170] sm:$0xff]  ;;  %v766_v49 = vld [vmem:[%s1544_s1 + $0x178] sm:$0xff]  ;;  %v1096_v50 = vpack.c.bf16 %v750_v47, %v749_v46  ;;  %v180_v52 = vld [vmem:[%s1544_s1] sm:$0xff]  ;;  %s734_s5 = sshll.u32 %s1548_s29, 3 }
  0x10   : > { %s165_s25 = scalar_lea.vmem %s1543_s0, %s802_s14  ;;  %v1160_v51 = vpack.c.bf16 %v766_v49, %v765_v48  ;;  %v181_v53 = vld [vmem:[%s1544_s1 + $0x8] sm:$0xff]  ;;  %v767_v54 = vld [vmem:[%s1544_s1 + $0x180] sm:$0xff]  ;;  %v182_v58 = vld [vmem:[%s1544_s1 + $0x10] sm:$0xff]  ;;  %s170_s8 = scalar_lea.vmem %s1546_s3, %s734_s5 }
  0x11   : > { %v174_v27 = vld [vmem:[%s165_s25] sm:$0xff]  ;;  %1079 = vmatpush3.bf16.msra.mxu1 %v1076_v17  ;;  %v1349_v30 = vld [vmem:[%s165_s25 + $0x8] sm:$0xff]  ;;  %v1100_v56 = vpack.c.bf16 %v181_v53, %v180_v52  ;;  %v183_v59 = vld [vmem:[%s1544_s1 + $0x18] sm:$0xff] }
  0x12   : > { %176 = vst [vmem:[#allocation2 + $0x2] sm:$0xff] %v174_v27  ;;  %995 = vmatprep.mubr.f32.mxu0 %v174_v27  ;;  %1143 = vmatpush3.bf16.msra.mxu0 %v1140_v18  ;;  %177 = vst [vmem:[#allocation2 + $0xa] sm:$0xff] %v1349_v30  ;;  %v768_v55 = vld [vmem:[%s1544_s1 + $0x188] sm:$0xff]  ;;  %v769_v60 = vld [vmem:[%s1544_s1 + $0x190] sm:$0xff]  ;;  %v1104_v63 = vpack.c.bf16 %v183_v59, %v182_v58 }
  0x13   : > { %1081 = vmatprep.subr.bf16.mxu1 %v1080_v23  ;;  %1145 = vmatprep.subr.bf16.mxu0 %v1144_v24  ;;  %v1164_v57 = vpack.c.bf16 %v768_v55, %v767_v54  ;;  %v770_v61 = vld [vmem:[%s1544_s1 + $0x198] sm:$0xff]  ;;  %v184_v1 = vld [vmem:[%s1544_s1 + $0x20] sm:$0xff]  ;;  %v185_v2 = vld [vmem:[%s1544_s1 + $0x28] sm:$0xff] }
  0x14   : > { %v1168_v0 = vpack.c.bf16 %v770_v61, %v769_v60  ;;  %v771_v3 = vld [vmem:[%s1544_s1 + $0x1a0] sm:$0xff]  ;;  %v772_v4 = vld [vmem:[%s1544_s1 + $0x1a8] sm:$0xff]  ;;  %v1108_v7 = vpack.c.bf16 %v185_v2, %v184_v1  ;;  %v186_v9 = vld [vmem:[%s1544_s1 + $0x30] sm:$0xff] }
  0x15   : > { %1083 = vmatpush3.bf16.msra.mxu1 %v1080_v23  ;;  %v1172_v8 = vpack.c.bf16 %v772_v4, %v771_v3  ;;  %v187_v10 = vld [vmem:[%s1544_s1 + $0x38] sm:$0xff]  ;;  %v773_v11 = vld [vmem:[%s1544_s1 + $0x1b0] sm:$0xff]  ;;  %v188_v15 = vld [vmem:[%s1544_s1 + $0x40] sm:$0xff] }
  0x16   : > { %1147 = vmatpush3.bf16.msra.mxu0 %v1144_v24  ;;  %1085 = vmatprep.subr.bf16.mxu1 %v1084_v31  ;;  %v774_v12 = vld [vmem:[%s1544_s1 + $0x1b8] sm:$0xff]  ;;  %v1112_v13 = vpack.c.bf16 %v187_v10, %v186_v9  ;;  %v189_v16 = vld [vmem:[%s1544_s1 + $0x48] sm:$0xff]  ;;  %v775_v17 = vld [vmem:[%s1544_s1 + $0x1c0] sm:$0xff] }
  0x17   : > { %1149 = vmatprep.subr.bf16.mxu0 %v1148_v32  ;;  %v1176_v14 = vpack.c.bf16 %v774_v12, %v773_v11  ;;  %v776_v18 = vld [vmem:[%s1544_s1 + $0x1c8] sm:$0xff]  ;;  %v1116_v19 = vpack.c.bf16 %v189_v16, %v188_v15  ;;  %v190_v21 = vld [vmem:[%s1544_s1 + $0x50] sm:$0xff]  ;;  %v191_v22 = vld [vmem:[%s1544_s1 + $0x58] sm:$0xff] }
  0x18   : > { %v1180_v20 = vpack.c.bf16 %v776_v18, %v775_v17  ;;  %v777_v23 = vld [vmem:[%s1544_s1 + $0x1d0] sm:$0xff]  ;;  %v778_v24 = vld [vmem:[%s1544_s1 + $0x1d8] sm:$0xff]  ;;  %v1120_v25 = vpack.c.bf16 %v191_v22, %v190_v21  ;;  %v192_v27 = vld [vmem:[%s1544_s1 + $0x60] sm:$0xff] }
  0x19   : > { %v196_v41 = vld [vmem:[#allocation2 + $0x1] sm:$0xff]  ;;  %1087 = vmatpush3.bf16.msra.mxu1 %v1084_v31  ;;  %v197_v62 = vld [vmem:[#allocation2 + $0x9] sm:$0xff]  ;;  %v1184_v26 = vpack.c.bf16 %v778_v24, %v777_v23  ;;  %v195_v34 = vld [vmem:[%s1544_s1 + $0x78] sm:$0xff] }
  0x1a   : > { %925 = vmatprep.mubr.f32.mxu1 %v196_v41  ;;  %1151 = vmatpush3.bf16.msra.mxu0 %v1148_v32  ;;  %v178_v5 = vld [vmem:[#allocation2] sm:$0xff]  ;;  %v193_v28 = vld [vmem:[%s1544_s1 + $0x68] sm:$0xff]  ;;  %v194_v33 = vld [vmem:[%s1544_s1 + $0x70] sm:$0xff] }
  0x1b   : > { %1089 = vmatprep.subr.bf16.mxu1 %v1088_v37  ;;  %1153 = vmatprep.subr.bf16.mxu0 %v1152_v38  ;;  %v461_v6 = vld [vmem:[#allocation2 + $0x3] sm:$0xff]  ;;  %v1124_v31 = vpack.c.bf16 %v193_v28, %v192_v27  ;;  %v781_v35 = vld [vmem:[%s1544_s1 + $0x1f0] sm:$0xff]  ;;  %v782_v36 = vld [vmem:[%s1544_s1 + $0x1f8] sm:$0xff] }
  0x1c   : > { %v779_v29 = vld [vmem:[%s1544_s1 + $0x1e0] sm:$0xff]  ;;  %v784_v40 = vld [vmem:[%s1544_s1 + $0x208] sm:$0xff]  ;;  %v785_v42 = vld [vmem:[%s1544_s1 + $0x210] sm:$0xff] }
  0x1d   : > { %1091 = vmatpush3.bf16.msra.mxu1 %v1088_v37  ;;  %v1128_v37 = vpack.c.bf16 %v195_v34, %v194_v33  ;;  %v783_v39 = vld [vmem:[%s1544_s1 + $0x200] sm:$0xff]  ;;  %v786_v43 = vld [vmem:[%s1544_s1 + $0x218] sm:$0xff]  ;;  %v788_v49 = vld [vmem:[%s1544_s1 + $0x228] sm:$0xff] }
  0x1e   : > { %1155 = vmatpush3.bf16.msra.mxu0 %v1152_v38  ;;  %1093 = vmatprep.subr.bf16.mxu1 %v1092_v44  ;;  %v1192_v38 = vpack.c.bf16 %v782_v36, %v781_v35  ;;  %v1196_v41 = vpack.c.bf16 %v784_v40, %v783_v39  ;;  %v1200_v46 = vpack.c.bf16 %v786_v43, %v785_v42  ;;  %v557_v47 = vld [vmem:[#allocation2 + $0x4] sm:$0xff]  ;;  %v790_v52 = vld [vmem:[%s1544_s1 + $0x238] sm:$0xff]  ;;  %v558_v2 = vld [vmem:[#allocation2 + $0xc] sm:$0xff] }
  0x1f   : > { %1157 = vmatprep.subr.bf16.mxu0 %v1156_v45  ;;  %v787_v48 = vld [vmem:[%s1544_s1 + $0x220] sm:$0xff]  ;;  %v792_v55 = vld [vmem:[%s1544_s1 + $0x248] sm:$0xff]  ;;  %v794_v58 = vld [vmem:[%s1544_s1 + $0x258] sm:$0xff] }
  0x20   : > { %v791_v54 = vld [vmem:[%s1544_s1 + $0x240] sm:$0xff]  ;;  %v796_v61 = vld [vmem:[%s1544_s1 + $0x268] sm:$0xff] }
  0x21   : > { %1095 = vmatpush3.bf16.msra.mxu1 %v1092_v44  ;;  %v179_v44 = vld [vmem:[#allocation2 + $0x8] sm:$0xff]  ;;  %v795_v60 = vld [vmem:[%s1544_s1 + $0x260] sm:$0xff] }
  0x22   : > { %1159 = vmatpush3.bf16.msra.mxu0 %v1156_v45  ;;  %1097 = vmatprep.subr.bf16.mxu1 %v1096_v50  ;;  %v462_v45 = vld [vmem:[#allocation2 + $0xb] sm:$0xff] }
  0x23   : > { %1161 = vmatprep.subr.bf16.mxu0 %v1160_v51 }
  0x25   : > { %1099 = vmatpush3.bf16.msra.mxu1 %v1096_v50  ;;  %v1204_v50 = vpack.c.bf16 %v788_v49, %v787_v48 }
  0x26   : > { %1163 = vmatpush3.bf16.msra.mxu0 %v1160_v51  ;;  %1101 = vmatprep.subr.bf16.mxu1 %v1100_v56  ;;  %v789_v51 = vld [vmem:[%s1544_s1 + $0x230] sm:$0xff] }
  0x27   : > { %1165 = vmatprep.subr.bf16.mxu0 %v1164_v57  ;;  %v1208_v53 = vpack.c.bf16 %v790_v52, %v789_v51 }
  0x28   : > { %926 = vmatmul.mubr.f32.vlgmr.msra.gmra.mrb[0].mxu1 %v197_v62  ;;  %v1220_v62 = vpack.c.bf16 %v796_v61, %v795_v60 }
  0x29   : > { %1103 = vmatpush3.bf16.msra.mxu1 %v1100_v56  ;;  %996 = vmatmul.mubr.f32.vlgmr.msra.gmra.mrb[0].mxu0 %v1349_v30  ;;  %v780_v30 = vld [vmem:[%s1544_s1 + $0x1e8] sm:$0xff]  ;;  %v1212_v56 = vpack.c.bf16 %v792_v55, %v791_v54 }
  0x2a   : > { %1167 = vmatpush3.bf16.msra.mxu0 %v1164_v57  ;;  %1105 = vmatprep.subr.bf16.mxu1 %v1104_v63  ;;  %v1188_v32 = vpack.c.bf16 %v780_v30, %v779_v29  ;;  %v793_v57 = vld [vmem:[%s1544_s1 + $0x250] sm:$0xff] }
  0x2b   : > { %1169 = vmatprep.subr.bf16.mxu0 %v1168_v0  ;;  %960 = vmatprep.mubr.f32.mxu1 %v178_v5  ;;  %v1216_v59 = vpack.c.bf16 %v794_v58, %v793_v57 }
  0x2c   : > { %1030 = vmatprep.mubr.f32.mxu0 %v461_v6  ;;  %v799_v6 = vld [vmem:[%s1545_s2] ss:$0 sm:$0xff] }
  0x2d   : > { %1107 = vmatpush3.bf16.msra.mxu1 %v1104_v63  ;;  %v797_v63 = vld [vmem:[%s1544_s1 + $0x270] sm:$0xff] }
  0x2e   : > { %1171 = vmatpush3.bf16.msra.mxu0 %v1168_v0  ;;  %1109 = vmatprep.subr.bf16.mxu1 %v1108_v7  ;;  %v798_v0 = vld [vmem:[%s1544_s1 + $0x278] sm:$0xff] }
  0x2f   : > { %1173 = vmatprep.subr.bf16.mxu0 %v1172_v8  ;;  %v1224_v1 = vpack.c.bf16 %v798_v0, %v797_v63 }
  0x31   : > { %1111 = vmatpush3.bf16.msra.mxu1 %v1108_v7 }
  0x32   : > { %1175 = vmatpush3.bf16.msra.mxu0 %v1172_v8  ;;  %1113 = vmatprep.subr.bf16.mxu1 %v1112_v13 }
  0x33   : > { %1177 = vmatprep.subr.bf16.mxu0 %v1176_v14 }
  0x35   : > { %1115 = vmatpush3.bf16.msra.mxu1 %v1112_v13 }
  0x36   : > { %1179 = vmatpush3.bf16.msra.mxu0 %v1176_v14  ;;  %1117 = vmatprep.subr.bf16.mxu1 %v1116_v19 }
  0x37   : > { %1181 = vmatprep.subr.bf16.mxu0 %v1180_v20 }
  0x39   : > { %1119 = vmatpush3.bf16.msra.mxu1 %v1116_v19 }
  0x3a   : > { %1183 = vmatpush3.bf16.msra.mxu0 %v1180_v20  ;;  %1121 = vmatprep.subr.bf16.mxu1 %v1120_v25 }
  0x3b   : > { %1185 = vmatprep.subr.bf16.mxu0 %v1184_v26 }
  0x3d   : > { %1123 = vmatpush3.bf16.msra.mxu1 %v1120_v25 }
  0x3e   : > { %1187 = vmatpush3.bf16.msra.mxu0 %v1184_v26  ;;  %1125 = vmatprep.subr.bf16.mxu1 %v1124_v31 }
  0x3f   : > { %1189 = vmatprep.subr.bf16.mxu0 %v1188_v32 }
  0x41   : > { %1127 = vmatpush3.bf16.msra.mxu1 %v1124_v31 }
  0x42   : > { %1191 = vmatpush3.bf16.msra.mxu0 %v1188_v32  ;;  %1129 = vmatprep.subr.bf16.mxu1 %v1128_v37 }
  0x43   : > { %1193 = vmatprep.subr.bf16.mxu0 %v1192_v38 }
  0x45   : > { %1131 = vmatpush3.bf16.msra.mxu1 %v1128_v37 }
  0x46   : > { %1195 = vmatpush3.bf16.msra.mxu0 %v1192_v38 }
  0x47   : > { %1197 = vmatprep.subr.bf16.mxu0 %v1196_v41 }
  0x48   : > { %961 = vmatmul.mubr.f32.vlgmr.msra.gmra.mrb[0].mxu1 %v179_v44 }
  0x49   : > { %1031 = vmatmul.mubr.f32.vlgmr.msra.gmra.mrb[0].mxu0 %v462_v45 }
  0x4a   : > { %1199 = vmatpush3.bf16.msra.mxu0 %v1196_v41  ;;  %1065 = vmatprep.mubr.f32.mxu0 %v557_v47 }
  0x4b   : > { %1201 = vmatprep.subr.bf16.mxu0 %v1200_v46 }
  0x4e   : > { %1203 = vmatpush3.bf16.msra.mxu0 %v1200_v46 }
  0x4f   : > { %1205 = vmatprep.subr.bf16.mxu0 %v1204_v50 }
  0x52   : > { %1207 = vmatpush3.bf16.msra.mxu0 %v1204_v50 }
  0x53   : > { %1209 = vmatprep.subr.bf16.mxu0 %v1208_v53 }
  0x56   : > { %1211 = vmatpush3.bf16.msra.mxu0 %v1208_v53 }
  0x57   : > { %1213 = vmatprep.subr.bf16.mxu0 %v1212_v56 }
  0x5a   : > { %1215 = vmatpush3.bf16.msra.mxu0 %v1212_v56 }
  0x5b   : > { %1217 = vmatprep.subr.bf16.mxu0 %v1216_v59 }
  0x5e   : > { %1219 = vmatpush3.bf16.msra.mxu0 %v1216_v59 }
  0x5f   : > { %1221 = vmatprep.subr.bf16.mxu0 %v1220_v62 }
  0x62   : > { %1223 = vmatpush3.bf16.msra.mxu0 %v1220_v62 }
  0x63   : > { %1225 = vmatprep.subr.bf16.mxu0 %v1224_v1 }
  0x66   : > { %1227 = vmatpush3.bf16.msra.mxu0 %v1224_v1 }
  0x69   : > { %1066 = vmatmul.mubr.f32.vlgmr.msra.gmra.mrb[0].mxu0 %v558_v2 }
 0x11b   : > { %v962_v3 = vpop.f32.mrb[0].mxu1 }
 0x11c   : > { %v356_v4 = vpop.f32.mrb[1].mxu1 }
 0x13c   : > { %v1067_v5 = vpop.f32.mrb[0].mxu0 }
 0x13d   : > { %v1228_v7 = vadd.f32 %v1067_v5, %v962_v3  ;;  %v642_v8 = vpop.f32.mrb[1].mxu0 }
 0x13e   : > { %v1229_v9 = vadd.f32 %v642_v8, %v356_v4 }
 0x13f   : > { %v661_v10 = vadd.f32 %v1228_v7, %v799_v6 }
 0x140   : > { %v660_v11 = vadd.f32 %v1229_v9, %v799_v6 }
 0x141   : > { %v665_v12 = vmul.f32 0.01, %v661_v10  ;;  %vm663_vm0 = vcmp.gt.f32.partialorder %v661_v10, 0.0 }
 0x142   : > { %vm662_vm1 = vcmp.gt.f32.partialorder %v660_v11, 0.0  ;;  %v664_v13 = vmul.f32 0.01, %v660_v11 }
 0x143   : > { %v667_v15 = vsel %vm663_vm0, %v661_v10, %v665_v12 }
 0x144   : > { %v666_v14 = vsel %vm662_vm1, %v660_v11, %v664_v13  ;;  %669 = vst [vmem:[%s170_s8 + $0x8] sm:$0xff] %v667_v15 }
 0x145   : > { %668 = vst [vmem:[%s170_s8] sm:$0xff] %v666_v14 }
 0x146 PF: > { %s13_s12 = sadd.s32 1, %s1251_s12  }
 0x147   : > { %p10_p5 = scmp.ge.s32.totalorder %s13_s12, 4  }
 0x149   :  { %12 = sbr.rel (!%p10_p5) target bundleno = 1 (0x1), region = 66 }

</bundles_post_ra>
